<compile_context>
chip_gen: v6e
topology: v6e:2x2x1
jax: 0.10.0
libtpu: 0.0.40
codegen_flags: <defaults>
</compile_context>

<pallas_src>
import functools

import jax
import jax.numpy as jnp
from jax.experimental import pallas as pl
from jax.experimental.pallas import tpu as pltpu


HIDDEN_SIZES = [32, 32, 16]
_LANE = 128              # batch tiles are multiples of the 128-lane vreg width
_MAX_TM = 16384          # batch-tile cap; per-step traffic ~44*TM bytes, well under VMEM
_MIN_PALLAS_BATCH = 512  # below this a fused XLA dot chain beats any kernel launch


def _value_mlp_kernel(x_ref,
                      w1_ref, b1_ref,
                      w2_ref, b2_ref,
                      w3_ref, b3_ref,
                      w4_ref, b4_ref,
                      o_ref):
    """One batch tile. Batch lives on lanes; weights are PyTorch (out_feat, in_feat)."""
    x = x_ref[...]                                     # (S+A, TM) bf16

    # layer 1: relu(W1 @ x + b1) -> (32, TM); concat already folded into x host-side
    h = jnp.dot(w1_ref[...], x, preferred_element_type=jnp.float32) + b1_ref[...]
    h = jnp.maximum(h, 0.0).astype(jnp.bfloat16)

    # layer 2: relu(W2 @ h + b2) -> (32, TM)
    h = jnp.dot(w2_ref[...], h, preferred_element_type=jnp.float32) + b2_ref[...]
    h = jnp.maximum(h, 0.0).astype(jnp.bfloat16)

    # layer 3: relu(W3 @ h + b3) -> (16, TM)
    h = jnp.dot(w3_ref[...], h, preferred_element_type=jnp.float32) + b3_ref[...]
    h = jnp.maximum(h, 0.0)                            # keep f32 for the VPU output layer

    # output layer (16 -> 1) on VPU/XLU: broadcast-mul + sublane reduce, lane-dense (1, TM)
    o_ref[...] = jnp.sum(w4_ref[...] * h, axis=0, keepdims=True) + b4_ref[...]


def _choose_tiling(batch):
    """Padding-aware tiles: pad only to 128-lane groups; >=2 blocks when possible (v7x)."""
    lanes = -(-batch // _LANE)                  # number of 128-lane groups needed
    max_lanes_per_tile = _MAX_TM // _LANE
    n_blocks = -(-lanes // max_lanes_per_tile)  # minimum blocks so tm <= _MAX_TM
    if lanes >= 2:
        n_blocks = max(n_blocks, 2)             # keep both v7x TensorCores busy
    tile_lanes = -(-lanes // n_blocks)
    tm = tile_lanes * _LANE
    b_pad = tm * n_blocks
    return tm, n_blocks, b_pad


def _mlp_bf16(x, params):
    """Fused XLA path mirroring the kernel's bf16-matmul / f32-accumulate numerics."""
    (w1, b1), (w2, b2), (w3, b3), (w4, b4) = params
    h = jnp.dot(x.astype(jnp.bfloat16), w1.T.astype(jnp.bfloat16),
                preferred_element_type=jnp.float32) + b1
    h = jnp.maximum(h, 0.0).astype(jnp.bfloat16)
    h = jnp.dot(h, w2.T.astype(jnp.bfloat16), preferred_element_type=jnp.float32) + b2
    h = jnp.maximum(h, 0.0).astype(jnp.bfloat16)
    h = jnp.dot(h, w3.T.astype(jnp.bfloat16), preferred_element_type=jnp.float32) + b3
    h = jnp.maximum(h, 0.0)
    return h @ w4.T.astype(jnp.float32) + b4


@functools.partial(jax.jit, static_argnames=("min_pallas_batch",))
def value_brain_forward(state, action, params, *, min_pallas_batch=_MIN_PALLAS_BATCH):
    """Pallas forward of cat([state, action], 1) -> MLP(32, 32, 16, 1)."""
    B, S = state.shape
    _, A = action.shape
    (w1, b1), (w2, b2), (w3, b3), (w4, b4) = params

    # Small-batch fallback: fused XLA dot chain is strictly faster than a kernel launch.
    if B < min_pallas_batch:
        return _mlp_bf16(jnp.concatenate([state, action], axis=1), params)

    tm, n_blocks, b_pad = _choose_tiling(B)

    # Single fused layout pass: concat + transpose + bf16 cast + pad -> (S+A, b_pad).
    # State columns first, then action, matching torch.cat([state, action], 1).
    xt = jnp.pad(
        jnp.concatenate([state, action], axis=1).T.astype(jnp.bfloat16),
        ((0, 0), (0, b_pad - B)))

    # Weights stay PyTorch-native (out_feat, in_feat); full W1, no state/action split.
    w1b = w1.astype(jnp.bfloat16)
    w2b = w2.astype(jnp.bfloat16)
    w3b = w3.astype(jnp.bfloat16)
    w4c = w4.reshape(-1, 1).astype(jnp.float32)     # (16, 1): VPU output layer stays f32
    b1c = b1.reshape(-1, 1).astype(jnp.float32)     # (32, 1)
    b2c = b2.reshape(-1, 1).astype(jnp.float32)     # (32, 1)
    b3c = b3.reshape(-1, 1).astype(jnp.float32)     # (16, 1)
    b4c = b4.reshape(1, 1).astype(jnp.float32)      # (1, 1)

    def resident(arr):
        nd = arr.ndim
        return pl.BlockSpec(arr.shape, lambda i, nd=nd: (0,) * nd)

    out = pl.pallas_call(
        _value_mlp_kernel,
        out_shape=jax.ShapeDtypeStruct((1, b_pad), jnp.float32),
        grid=(n_blocks,),
        in_specs=[
            pl.BlockSpec((S + A, tm), lambda i: (0, i)),   # activation tile, batch on lanes
            resident(w1b), resident(b1c),
            resident(w2b), resident(b2c),
            resident(w3b), resident(b3c),
            resident(w4c), resident(b4c),
        ],
        out_specs=pl.BlockSpec((1, tm), lambda i: (0, i)),
        compiler_params=pltpu.CompilerParams(
            dimension_semantics=("parallel",),
            vmem_limit_bytes=32 * 1024 * 1024),   # insurance for v5e's 16 MiB default
    )(xt, w1b, b1c, w2b, b2c, w3b, b3c, w4c, b4c)

    return out[0, :B].reshape(B, 1)


def init_params(key, state_size, action_size, hidden_sizes=HIDDEN_SIZES):
    """Deterministic init matching nn.Linear layout: W is (out, in), b is (out,)."""
    sizes = [state_size + action_size] + list(hidden_sizes) + [1]
    params = []
    for i in range(len(sizes) - 1):
        fan_in, fan_out = sizes[i], sizes[i + 1]
        key, kw, kb = jax.random.split(key, 3)
        bound = 1.0 / float(fan_in) ** 0.5
        w = jax.random.uniform(kw, (fan_out, fan_in), jnp.float32, -bound, bound)
        b = jax.random.uniform(kb, (fan_out,), jnp.float32, -bound, bound)
        params.append((w, b))
    return params


def _reference_f32(state, action, params):
    """Exact f32 semantics of the PyTorch module."""
    x = jnp.concatenate([state, action], axis=1).astype(jnp.float32)
    for (w, b) in params[:-1]:
        x = jnp.maximum(x @ w.T + b, 0.0)
    w, b = params[-1]
    return x @ w.T + b


def _reference_matched(state, action, params):
    """Mirrors the kernel's bf16-matmul / f32-accumulate numerics."""
    return _mlp_bf16(jnp.concatenate([state, action], axis=1), params)


if __name__ == "__main__":
    state_size = 16
    action_size = 4

    key = jax.random.PRNGKey(0)
    k_s1, k_a1, k_s2, k_a2, k_params = jax.random.split(key, 5)
    params = init_params(k_params, state_size, action_size)

    # 1) tiny batch, Pallas path forced (exercises the kernel at small shapes)
    batch = 8
    state = jax.random.normal(k_s1, (batch, state_size), jnp.float32)
    action = jax.random.normal(k_a1, (batch, action_size), jnp.float32)
    out = jax.block_until_ready(
        value_brain_forward(state, action, params, min_pallas_batch=0))
    assert out.shape == (batch, 1)
    # Tight check against a reference with identical bf16/f32 numerics.
    assert jnp.allclose(out, _reference_matched(state, action, params), atol=1e-3, rtol=1e-3)
    # Loose sanity check against pure-f32 module semantics (bf16 rounding).
    assert jnp.allclose(out, _reference_f32(state, action, params), atol=1e-1, rtol=1e-1)

    # tiny batch, default path (fused XLA fallback) must agree as well
    out_fb = jax.block_until_ready(value_brain_forward(state, action, params))
    assert out_fb.shape == (batch, 1)
    assert jnp.allclose(out_fb, _reference_matched(state, action, params), atol=1e-3, rtol=1e-3)

    # 2) multi-block batch (padding-aware tiling + 2 parallel grid blocks)
    batch2 = 300
    state2 = jax.random.normal(k_s2, (batch2, state_size), jnp.float32)
    action2 = jax.random.normal(k_a2, (batch2, action_size), jnp.float32)
    out2 = jax.block_until_ready(
        value_brain_forward(state2, action2, params, min_pallas_batch=0))
    assert out2.shape == (batch2, 1)
    assert jnp.allclose(out2, _reference_matched(state2, action2, params), atol=1e-3, rtol=1e-3)

    print("KERNEL_OK")
</pallas_src>

<mosaic_0001>
module attributes {stable_mosaic.version = 11 : i64} {
  func.func @_value_mlp_kernel(%arg0: i32, %arg1: memref<20x128xbf16, #tpu.memory_space<vmem>>, %arg2: memref<32x20xbf16, #tpu.memory_space<vmem>>, %arg3: memref<32x1xf32, #tpu.memory_space<vmem>>, %arg4: memref<32x32xbf16, #tpu.memory_space<vmem>>, %arg5: memref<32x1xf32, #tpu.memory_space<vmem>>, %arg6: memref<16x32xbf16, #tpu.memory_space<vmem>>, %arg7: memref<16x1xf32, #tpu.memory_space<vmem>>, %arg8: memref<16x1xf32, #tpu.memory_space<vmem>>, %arg9: memref<1x1xf32, #tpu.memory_space<vmem>>, %arg10: memref<1x128xf32, #tpu.memory_space<vmem>>) attributes {dimension_semantics = [#tpu.dimension_semantics<parallel>], iteration_bounds = array<i64: 1>, scalar_prefetch = 0 : i64, scratch_operands = 0 : i64, tpu.core_type = #tpu.core_type<tc>, window_params = [{transform_indices = @transform_0, window_bounds = array<i64: 20, 128>}, {pipeline_mode = #tpu.pipeline_mode<synchronous>, transform_indices = @transform_1, window_bounds = array<i64: 32, 20>}, {pipeline_mode = #tpu.pipeline_mode<synchronous>, transform_indices = @transform_2, window_bounds = array<i64: 32, 1>}, {pipeline_mode = #tpu.pipeline_mode<synchronous>, transform_indices = @transform_3, window_bounds = array<i64: 32, 32>}, {pipeline_mode = #tpu.pipeline_mode<synchronous>, transform_indices = @transform_4, window_bounds = array<i64: 32, 1>}, {pipeline_mode = #tpu.pipeline_mode<synchronous>, transform_indices = @transform_5, window_bounds = array<i64: 16, 32>}, {pipeline_mode = #tpu.pipeline_mode<synchronous>, transform_indices = @transform_6, window_bounds = array<i64: 16, 1>}, {pipeline_mode = #tpu.pipeline_mode<synchronous>, transform_indices = @transform_7, window_bounds = array<i64: 16, 1>}, {pipeline_mode = #tpu.pipeline_mode<synchronous>, transform_indices = @transform_8, window_bounds = array<i64: 1, 1>}, {transform_indices = @transform_9, window_bounds = array<i64: 1, 128>}]} {
    %c0 = arith.constant 0 : index
    %c0_0 = arith.constant 0 : index
    %0 = vector.load %arg1[%c0, %c0_0] : memref<20x128xbf16, #tpu.memory_space<vmem>>, vector<20x128xbf16>
    %c0_1 = arith.constant 0 : index
    %c0_2 = arith.constant 0 : index
    %1 = vector.load %arg2[%c0_1, %c0_2] : memref<32x20xbf16, #tpu.memory_space<vmem>>, vector<32x20xbf16>
    %cst = arith.constant dense<0.000000e+00> : vector<32x128xf32>
    %2 = tpu.matmul %1, %0, %cst {dimension_numbers = #tpu.dot_dimension_numbers<[1], [0], [0], [1], [0, 0, 1, 1], [], []>} : vector<32x20xbf16>, vector<20x128xbf16>, vector<32x128xf32> -> vector<32x128xf32>
    %c0_3 = arith.constant 0 : index
    %c0_4 = arith.constant 0 : index
    %3 = vector.load %arg3[%c0_3, %c0_4] : memref<32x1xf32, #tpu.memory_space<vmem>>, vector<32x1xf32>
    %4 = vector.broadcast %3 : vector<32x1xf32> to vector<32x128xf32>
    %5 = arith.addf %2, %4 : vector<32x128xf32>
    %cst_5 = arith.constant 0.000000e+00 : f32
    %6 = vector.broadcast %cst_5 : f32 to vector<32x128xf32>
    %7 = arith.maximumf %5, %6 : vector<32x128xf32>
    %8 = arith.truncf %7 : vector<32x128xf32> to vector<32x128xbf16>
    %c0_6 = arith.constant 0 : index
    %c0_7 = arith.constant 0 : index
    %9 = vector.load %arg4[%c0_6, %c0_7] : memref<32x32xbf16, #tpu.memory_space<vmem>>, vector<32x32xbf16>
    %cst_8 = arith.constant dense<0.000000e+00> : vector<32x128xf32>
    %10 = tpu.matmul %9, %8, %cst_8 {dimension_numbers = #tpu.dot_dimension_numbers<[1], [0], [0], [1], [0, 0, 1, 1], [], []>} : vector<32x32xbf16>, vector<32x128xbf16>, vector<32x128xf32> -> vector<32x128xf32>
    %c0_9 = arith.constant 0 : index
    %c0_10 = arith.constant 0 : index
    %11 = vector.load %arg5[%c0_9, %c0_10] : memref<32x1xf32, #tpu.memory_space<vmem>>, vector<32x1xf32>
    %12 = vector.broadcast %11 : vector<32x1xf32> to vector<32x128xf32>
    %13 = arith.addf %10, %12 : vector<32x128xf32>
    %cst_11 = arith.constant 0.000000e+00 : f32
    %14 = vector.broadcast %cst_11 : f32 to vector<32x128xf32>
    %15 = arith.maximumf %13, %14 : vector<32x128xf32>
    %16 = arith.truncf %15 : vector<32x128xf32> to vector<32x128xbf16>
    %c0_12 = arith.constant 0 : index
    %c0_13 = arith.constant 0 : index
    %17 = vector.load %arg6[%c0_12, %c0_13] : memref<16x32xbf16, #tpu.memory_space<vmem>>, vector<16x32xbf16>
    %cst_14 = arith.constant dense<0.000000e+00> : vector<16x128xf32>
    %18 = tpu.matmul %17, %16, %cst_14 {dimension_numbers = #tpu.dot_dimension_numbers<[1], [0], [0], [1], [0, 0, 1, 1], [], []>} : vector<16x32xbf16>, vector<32x128xbf16>, vector<16x128xf32> -> vector<16x128xf32>
    %c0_15 = arith.constant 0 : index
    %c0_16 = arith.constant 0 : index
    %19 = vector.load %arg7[%c0_15, %c0_16] : memref<16x1xf32, #tpu.memory_space<vmem>>, vector<16x1xf32>
    %20 = vector.broadcast %19 : vector<16x1xf32> to vector<16x128xf32>
    %21 = arith.addf %18, %20 : vector<16x128xf32>
    %cst_17 = arith.constant 0.000000e+00 : f32
    %22 = vector.broadcast %cst_17 : f32 to vector<16x128xf32>
    %23 = arith.maximumf %21, %22 : vector<16x128xf32>
    %c0_18 = arith.constant 0 : index
    %c0_19 = arith.constant 0 : index
    %24 = vector.load %arg8[%c0_18, %c0_19] : memref<16x1xf32, #tpu.memory_space<vmem>>, vector<16x1xf32>
    %25 = vector.broadcast %24 : vector<16x1xf32> to vector<16x128xf32>
    %26 = arith.mulf %25, %23 : vector<16x128xf32>
    %cst_20 = arith.constant dense<0.000000e+00> : vector<128xf32>
    %27 = vector.multi_reduction <add>, %26, %cst_20 [0] : vector<16x128xf32> to vector<128xf32>
    %28 = vector.shape_cast %27 : vector<128xf32> to vector<1x128xf32>
    %c0_21 = arith.constant 0 : index
    %c0_22 = arith.constant 0 : index
    %29 = vector.load %arg9[%c0_21, %c0_22] : memref<1x1xf32, #tpu.memory_space<vmem>>, vector<1x1xf32>
    %30 = vector.broadcast %29 : vector<1x1xf32> to vector<1x128xf32>
    %31 = arith.addf %28, %30 : vector<1x128xf32>
    %c0_23 = arith.constant 0 : index
    %c0_24 = arith.constant 0 : index
    %32 = vector.load %arg10[%c0_23, %c0_24] : memref<1x128xf32, #tpu.memory_space<vmem>>, vector<1x128xf32>
    tpu.vector_store %arg10[%c0_23, %c0_24], %31 {strides = array<i32>} : memref<1x128xf32, #tpu.memory_space<vmem>>, vector<1x128xf32>,
    return
  }
  func.func @transform_0(%arg0: i32) -> (i32, i32) {
    %c0_i32 = arith.constant 0 : i32
    %c0_i32_0 = arith.constant 0 : i32
    return %c0_i32, %arg0 : i32, i32
  }
  func.func @transform_1(%arg0: i32) -> (i32, i32) {
    %c0_i32 = arith.constant 0 : i32
    %c0_i32_0 = arith.constant 0 : i32
    %c0_i32_1 = arith.constant 0 : i32
    return %c0_i32, %c0_i32_0 : i32, i32
  }
  func.func @transform_2(%arg0: i32) -> (i32, i32) {
    %c0_i32 = arith.constant 0 : i32
    %c0_i32_0 = arith.constant 0 : i32
    %c0_i32_1 = arith.constant 0 : i32
    return %c0_i32, %c0_i32_0 : i32, i32
  }
  func.func @transform_3(%arg0: i32) -> (i32, i32) {
    %c0_i32 = arith.constant 0 : i32
    %c0_i32_0 = arith.constant 0 : i32
    %c0_i32_1 = arith.constant 0 : i32
    return %c0_i32, %c0_i32_0 : i32, i32
  }
  func.func @transform_4(%arg0: i32) -> (i32, i32) {
    %c0_i32 = arith.constant 0 : i32
    %c0_i32_0 = arith.constant 0 : i32
    %c0_i32_1 = arith.constant 0 : i32
    return %c0_i32, %c0_i32_0 : i32, i32
  }
  func.func @transform_5(%arg0: i32) -> (i32, i32) {
    %c0_i32 = arith.constant 0 : i32
    %c0_i32_0 = arith.constant 0 : i32
    %c0_i32_1 = arith.constant 0 : i32
    return %c0_i32, %c0_i32_0 : i32, i32
  }
  func.func @transform_6(%arg0: i32) -> (i32, i32) {
    %c0_i32 = arith.constant 0 : i32
    %c0_i32_0 = arith.constant 0 : i32
    %c0_i32_1 = arith.constant 0 : i32
    return %c0_i32, %c0_i32_0 : i32, i32
  }
  func.func @transform_7(%arg0: i32) -> (i32, i32) {
    %c0_i32 = arith.constant 0 : i32
    %c0_i32_0 = arith.constant 0 : i32
    %c0_i32_1 = arith.constant 0 : i32
    return %c0_i32, %c0_i32_0 : i32, i32
  }
  func.func @transform_8(%arg0: i32) -> (i32, i32) {
    %c0_i32 = arith.constant 0 : i32
    %c0_i32_0 = arith.constant 0 : i32
    %c0_i32_1 = arith.constant 0 : i32
    return %c0_i32, %c0_i32_0 : i32, i32
  }
  func.func @transform_9(%arg0: i32) -> (i32, i32) {
    %c0_i32 = arith.constant 0 : i32
    %c0_i32_0 = arith.constant 0 : i32
    return %c0_i32, %arg0 : i32, i32
  }
}

</mosaic_0001>

<bundles_post_ra>
// kernel: value_brain_forward.1
= control target key start
LH: loop header
LB: loop body
LE: loop exit
PB: predicated region body
PF: predicated region fallthrough
CT: control target
= control target key end

     0   :  { %vm92_vm0 = vcmask 1041408   ;;  %vm85_vm1 = vcmask 162816   ;;  %v413_v2 = vmov 0   ;;  %vm189_vm2 = vcmask 261120   ;;  %s534_s0 = inlined_call_operand.vmem [shape: bf16[20,128], index: 0, kind: input, shape index: {}]   ;;  %s535_s1 = inlined_call_operand.vmem [shape: bf16[32,20], index: 1, kind: input, shape index: {}]   ;;  %s536_s8 = inlined_call_operand.<no memory space> [shape: f32[1,1], index: 8, kind: input, shape index: {}]   ;;  %s537_s2 = inlined_call_operand.vmem [shape: f32[32,1], index: 2, kind: input, shape index: {}]   ;;  %s538_s4 = inlined_call_operand.vmem [shape: f32[32,1], index: 4, kind: input, shape index: {}]   ;;  %s539_s6 = inlined_call_operand.vmem [shape: f32[16,1], index: 6, kind: input, shape index: {}]   ;;  %s540_s7 = inlined_call_operand.vmem [shape: f32[16,1], index: 7, kind: input, shape index: {}]   ;;  %s541_s3 = inlined_call_operand.vmem [shape: bf16[32,32], index: 3, kind: input, shape index: {}]   ;;  %s542_s5 = inlined_call_operand.vmem [shape: bf16[16,32], index: 5, kind: input, shape index: {}]   ;;  %s543_s9 = inlined_call_operand.vmem [shape: f32[1,128], index: 9, kind: output, shape index: {}]  }
   0x1   :  { %v406_v0 = vld [vmem:[%s534_s0 + $0x8] ss:$0 sps:$4 sm:$0x33]   ;;  %v407_v1 = vld [vmem:[%s534_s0] sm:$0xff]   ;;  %404 = vset.pattern.permute.xlu0 %v413_v2  ;;  %405 = vset.pattern.permute.xlu1 %v413_v2  ;;  %v14_v3 = vstv %s536_s8  ;;  %v44_v6 = vld [vmem:[%s537_s2 + $0x10] sm:$0xff]  ;;  %v414_v40 = vmov 0.0  }
   0x2   :  { %15 = vst [vmem:[#allocation2] sm:$0x1] %v14_v3  ;;  %400 = vmatprep.subr.msk.bf16.mxu0 %vm92_vm0, %v406_v0  ;;  %v94_v4 = vsel %vm92_vm0, %v406_v0, 0  ;;  %v408_v5 = vld [vmem:[%s535_s1] sm:$0xff]   ;;  %58 = vperm.xlu0 %404, %v44_v6   ;;  %v409_v8 = vld [vmem:[%s535_s1 + $0x8] sm:$0xff]   ;;  %v45_v9 = vld [vmem:[%s537_s2 + $0x18] sm:$0xff] }
   0x3   :  { %377 = vmatpush3.bf16.msra.mxu0 %v94_v4  ;;  %380 = vmatprep.mubr.msk.bf16.mxu0 %vm85_vm1, %v408_v5  ;;  %v42_v7 = vld [vmem:[%s537_s2] sm:$0xff]  ;;  %v43_v10 = vld [vmem:[%s537_s2 + $0x8] sm:$0xff]  ;;  %v157_v11 = vld [vmem:[%s538_s4 + $0x10] sm:$0xff]  ;;  %vm415_vm3 = vmmov 0  }
   0x4   :  { %378 = vmatprep.subr.bf16.mxu0 %v407_v1  ;;  %48 = vperm.xlu1 %405, %v42_v7   ;;  %v158_v12 = vld [vmem:[%s538_s4 + $0x18] sm:$0xff]  ;;  %v155_v13 = vld [vmem:[%s538_s4] sm:$0xff]  ;;  %v156_v14 = vld [vmem:[%s538_s4 + $0x8] sm:$0xff] }
   0x5   :  { %v253_v15 = vld [vmem:[%s539_s6] sm:$0xff]  ;;  %v254_v16 = vld [vmem:[%s539_s6 + $0x8] sm:$0xff] }
   0x6   :  { %63 = vperm.xlu0 %404, %v45_v9   ;;  %v316_v17 = vld [vmem:[%s540_s7] sm:$0xff]  ;;  %v317_v18 = vld [vmem:[%s540_s7 + $0x8] sm:$0xff] }
   0x7   :  { %379 = vmatpush3.bf16.msra.mxu0 %v407_v1  ;;  %v410_v20 = vld [vmem:[%s541_s3] sm:$0xff]   ;;  %v411_v39 = vld [vmem:[%s541_s3 + $0x8] sm:$0xff]  }
   0x8   :  { %53 = vperm.xlu1 %405, %v43_v10   ;;  %388 = vmatprep.mubr.msk.bf16.mxu1 %vm189_vm2, %v410_v20  ;;  %v412_v59 = vld [vmem:[%s542_s5] sm:$0xff]   ;;  %v343_v10 = vlaneseq }
   0x9   :  { %v337_v19 = vld [vmem:[#allocation2] sm:$0x1]  ;;  %392 = vmatprep.subr.bf16.mxu0 %v414_v40 }
   0xa   :  { %381 = vmatmul.mubr.msk.bf16.vlgmr.msra.gmra.mxu0 %vm85_vm1, %v409_v8  ;;  %171 = vperm.xlu0 %404, %v157_v11  }
   0xb   :  { %396 = vmatprep.mubr.msk.bf16.mxu0 %vm415_vm3, %v414_v40 }
   0xc   :  { %176 = vperm.xlu1 %405, %v158_v12  }
   0xe   :  { %161 = vperm.xlu0 %404, %v155_v13   ;;  %v344_v13 = vshrl.u32 %v343_v10, 7 }
  0x10   :  { %166 = vperm.xlu1 %405, %v156_v14  }
  0x12   :  { %257 = vperm.xlu0 %404, %v253_v15  }
  0x14   :  { %262 = vperm.xlu1 %405, %v254_v16   ;;  %v345_v16 = vsub.s32 0, %v344_v13 }
  0x16   :  { %320 = vperm.xlu0 %404, %v316_v17  }
  0x18   :  { %325 = vperm.xlu1 %405, %v317_v18  }
  0x1a   :  { %340 = vperm.xlu0 %404, %v337_v19  }
  0x7d   :  { %v59_v21 = vpop.permute.xlu0 %58 }
  0x7f   :  { %v49_v22 = vpop.permute.xlu1 %48 }
  0x81   :  { %v64_v26 = vpop.permute.xlu0 %63 }
  0x83   :  { %v54_v30 = vpop.permute.xlu1 %53 }
  0x85   :  { %v172_v41 = vpop.permute.xlu0 %171 }
  0x87   :  { %v177_v42 = vpop.permute.xlu1 %176 }
  0x89   :  { %v162_v47 = vpop.permute.xlu0 %161 }
  0x8b   :  { %v167_v49 = vpop.permute.xlu1 %166 }
  0x8d   :  { %v258_v60 = vpop.permute.xlu0 %257 }
  0x8f   :  { %v263_v63 = vpop.permute.xlu1 %262 }
  0x91   :  { %v321_v6 = vpop.permute.xlu0 %320 }
  0x93   :  { %v326_v7 = vpop.permute.xlu1 %325 }
  0x95   :  { %v341_v18 = vpop.permute.xlu0 %340 }
  0x96   :  { %v346_v20 = vrot.slane %v341_v18, %v345_v16 }
  0xca   :  { %v382_v23 = vpop.f32.mrf.mxu0 }
  0xcb   :  { %v139_v25 = vadd.f32 %v382_v23, %v59_v21 }
  0xcc   :  { %v130_v24 = vpop.f32.mrf.mxu0 }
  0xcd   :  { %v131_v28 = vadd.f32 %v130_v24, %v49_v22  ;;  %v147_v32 = vmax.f32 %v139_v25, 0.0 }
  0xce   :  { %v383_v27 = vpop.f32.mrf.mxu0 }
  0xcf   :  { %v142_v29 = vadd.f32 %v383_v27, %v64_v26  ;;  %v145_v35 = vmax.f32 %v131_v28, 0.0 }
  0xd0   :  { %v133_v31 = vpop.f32.mrf.mxu0 }
  0xd1   :  { %v148_v33 = vmax.f32 %v142_v29, 0.0  ;;  %v134_v34 = vadd.f32 %v133_v31, %v54_v30 }
  0xd3   :  { %v146_v36 = vmax.f32 %v134_v34, 0.0  ;;  %v150_v37 = vpack.c.bf16 %v148_v33, %v147_v32 }
  0xd5   :  { %v149_v38 = vpack.c.bf16 %v146_v36, %v145_v35  ;;  %384 = vmatprep.subr.bf16.mxu1 %v150_v37 }
  0xd6   :  { %385 = vmatpush3.bf16.msra.mxu1 %v150_v37 }
  0xd7   :  { %386 = vmatprep.subr.bf16.mxu1 %v149_v38 }
  0xda   :  { %387 = vmatpush3.bf16.msra.mxu1 %v149_v38 }
  0xdd   :  { %389 = vmatmul.mubr.msk.bf16.vlgmr.msra.gmra.mxu1 %vm189_vm2, %v411_v39 }
 0x19d   :  { %v390_v43 = vpop.f32.mrf.mxu1 }
 0x19e   :  { %v239_v45 = vadd.f32 %v390_v43, %v172_v41 }
 0x19f   :  { %v230_v44 = vpop.f32.mrf.mxu1 }
 0x1a0   :  { %v247_v51 = vmax.f32 %v239_v45, 0.0  ;;  %v231_v52 = vadd.f32 %v230_v44, %v162_v47 }
 0x1a1   :  { %v391_v46 = vpop.f32.mrf.mxu1 }
 0x1a2   :  { %v242_v48 = vadd.f32 %v391_v46, %v177_v42  ;;  %v245_v57 = vmax.f32 %v231_v52, 0.0 }
 0x1a3   :  { %v233_v50 = vpop.f32.mrf.mxu1 }
 0x1a4   :  { %v248_v53 = vmax.f32 %v242_v48, 0.0  ;;  %v234_v54 = vadd.f32 %v233_v50, %v167_v49 }
 0x1a6   :  { %v250_v55 = vpack.c.bf16 %v248_v53, %v247_v51  ;;  %v246_v56 = vmax.f32 %v234_v54, 0.0 }
 0x1a8   :  { %393 = vmatpush3.bf16.msra.mxu0 %v250_v55  ;;  %v249_v58 = vpack.c.bf16 %v246_v56, %v245_v57 }
 0x1a9   :  { %394 = vmatprep.subr.bf16.mxu0 %v414_v40 }
 0x1ac   :  { %395 = vmatpush3.bf16.msra.mxu0 %v249_v58 }
 0x1af   :  { %397 = vmatmul.mubr.msk.bf16.vlgmr.msra.gmra.mxu0 %vm189_vm2, %v412_v59 }
 0x26f   :  { %v307_v61 = vpop.f32.mrf.mxu0 }
 0x270   :  { %v308_v62 = vadd.f32 %v307_v61, %v258_v60 }
 0x271   :  { %v398_v0 = vpop.f32.mrf.mxu0 }
 0x272   :  { %v314_v2 = vmax.f32 %v308_v62, 0.0 }
 0x273   :  { %v310_v1 = vpop.f32.mrf.mxu0 }
 0x274   :  { %v311_v3 = vadd.f32 %v310_v1, %v263_v63  ;;  %v328_v8 = vmul.f32 %v321_v6, %v314_v2 }
 0x275   :  { %v399_v4 = vpop.f32.mrf.mxu0 }
 0x276   :  { %v315_v5 = vmax.f32 %v311_v3, 0.0 }
 0x278   :  { %v329_v9 = vmul.f32 %v326_v7, %v315_v5 }
 0x27a   :  { %v330_v11 = vadd.f32 %v329_v9, %v328_v8 }
 0x27c   :  { %v331_v12 = vrot.slane %v330_v11, 4 }
 0x27e   :  { %v332_v14 = vadd.f32 %v331_v12, %v330_v11 }
 0x280   :  { %v333_v15 = vrot.slane %v332_v14, 2 }
 0x282   :  { %v334_v17 = vadd.f32 %v333_v15, %v332_v14 }
 0x284   :  { %v335_v19 = vrot.slane %v334_v17, 1 }
 0x286   :  { %v336_v21 = vadd.f32 %v335_v19, %v334_v17 }
 0x288   :  { %v347_v22 = vadd.f32 %v346_v20, %v336_v21 }
 0x28a   :  { %348 = vst [vmem:[%s543_s9] sm:$0x1] %v347_v22 }

</bundles_post_ra>
